<compile_context>
chip_gen: v7x
topology: tpu7x:2x2x1
jax: 0.10.0
libtpu: 0.0.40
codegen_flags: <defaults>
</compile_context>

<pallas_src>
import functools
import math

import jax
import jax.numpy as jnp
from jax.experimental import pallas as pl
from jax.experimental.pallas import tpu as pltpu

_SUBLANE = {4: 8, 2: 16, 1: 32}
_VMEM_BUDGET = 24 << 20      # target pipeline working set; fits v5e/v6e/v7x
_VMEM_LIMIT_CAP = 48 << 20   # stay well under v7x's 64 MiB physical VMEM


def _round_up(a, b):
    return (a + b - 1) // b * b


def _pick_tile(dim, want, granule):
    """Largest multiple of `granule` that is <= max(want, granule) and evenly
    divides round_up(dim, granule).  Returns (tile, padded_dim).

    Picking a divisor of the (granule-aligned) dim avoids padding operands
    beyond bare layout alignment -- in particular the weight is never copied
    when K and N are already 128-aligned."""
    dp = _round_up(max(dim, 1), granule)
    t = min(_round_up(max(want, granule), granule), dp)
    t = (t // granule) * granule
    while dp % t:
        t -= granule
    return t, dp


def _linear_add_add_kernel(*refs, has_bias, multi_k, acc_in_out):
    """One (tm, tn) output tile; optional reduction over K on grid axis 2."""
    x_ref, w_ref = refs[0], refs[1]
    i = 2
    b_ref = None
    if has_bias:
        b_ref = refs[i]
        i += 1
    y_ref, z_ref, o_ref = refs[i], refs[i + 1], refs[i + 2]
    acc_ref = refs[i + 3] if (multi_k and not acc_in_out) else None

    def _terms():
        t = y_ref[...].astype(jnp.float32) + z_ref[...].astype(jnp.float32)
        if has_bias:
            t = t + b_ref[...].astype(jnp.float32)
        return t

    partial = jnp.dot(x_ref[...], w_ref[...], preferred_element_type=jnp.float32)

    if not multi_k:
        o_ref[...] = (partial + _terms()).astype(o_ref.dtype)
    elif acc_in_out:
        # f32 output: the output block stays resident across the K axis, so
        # accumulate straight into it (no scratch, no final copy).
        k = pl.program_id(2)

        @pl.when(k == 0)
        def _():
            o_ref[...] = (partial + _terms()).astype(o_ref.dtype)

        @pl.when(k > 0)
        def _():
            o_ref[...] += partial
    else:
        k = pl.program_id(2)

        @pl.when(k == 0)
        def _():
            acc_ref[...] = partial

        @pl.when(k > 0)
        def _():
            acc_ref[...] += partial

        @pl.when(k == pl.num_programs(2) - 1)
        def _():
            o_ref[...] = (acc_ref[...] + _terms()).astype(o_ref.dtype)


@functools.partial(jax.jit, static_argnames=("tm", "tn", "tk"))
def linear_add_add(x, weight, bias, y, z, *, tm=512, tn=512, tk=1024):
    """out = x @ weight (+ bias) + y + z, fused in one Pallas kernel.

    x:      (..., K)
    weight: (K, N)       -- already transposed, as the IPEX module stores it
    bias:   (N,) or None
    y, z:   (..., N)     -- same leading dims as x
    Output dtype follows x.dtype (matches the torch op: mm result dtype, then
    in-place adds).
    """
    *lead, K = x.shape
    Kw, N = weight.shape
    assert K == Kw, "weight must be (in_features, out_features)"
    M = math.prod(lead) if lead else 1
    has_bias = bias is not None
    out_dtype = x.dtype
    acc_in_out = jnp.dtype(out_dtype) == jnp.float32

    # Sublane granule for the M axis: strictest over all arrays carrying an
    # M-sized block dim.
    sub = max(_SUBLANE.get(jnp.dtype(d).itemsize, 8)
              for d in (x.dtype, y.dtype, z.dtype, out_dtype))
    # Lane granule for N: prefer 256 (v6e/v7x MXU width) unless that would
    # force extra padding of the weight's N dimension.
    n_granule = 256 if _round_up(N, 128) % 256 == 0 else 128

    # Tile goals.  Small-M (decode-like) calls are weight-streaming bound:
    # cover all rows with a single M tile and grow the N/K tiles so the
    # weight is streamed exactly once in few, large grid steps.
    tm_goal, tn_goal, tk_goal = tm, tn, tk
    if _round_up(M, sub) <= 128:
        tm_goal = _round_up(M, sub)
        tn_goal = max(tn, 1024)
        tk_goal = max(tk, 2048)

    tm_eff, Mp = _pick_tile(M, tm_goal, sub)
    tn_eff, Np = _pick_tile(N, tn_goal, n_granule)
    tk_eff, Kp = _pick_tile(K, tk_goal, 128)

    def _it(d):
        return jnp.dtype(d).itemsize

    x_it, w_it = _it(x.dtype), _it(weight.dtype)
    y_it, z_it, o_it = _it(y.dtype), _it(z.dtype), _it(out_dtype)
    b_it = _it(bias.dtype) if has_bias else 0

    def _footprint(tm_, tn_, tk_):
        # Double-buffered pipeline blocks + (optional) f32 accumulator.
        byt = 2 * tm_ * tk_ * x_it + 2 * tk_ * tn_ * w_it
        byt += 2 * tm_ * tn_ * (y_it + z_it + o_it) + 2 * tn_ * b_it
        if (Kp // tk_) > 1 and not acc_in_out:
            byt += tm_ * tn_ * 4
        return byt

    def _shrink(dim, cur, granule):
        return _pick_tile(dim, max(cur // 2, granule), granule)[0]

    # Greedy shrink until the working set fits the budget.  K shrinks first:
    # it only adds per-step overhead, while tm/tn control HBM reuse of x / W.
    while _footprint(tm_eff, tn_eff, tk_eff) > _VMEM_BUDGET:
        if tk_eff > 128:
            tk_eff = _shrink(K, tk_eff, 128)
        elif tn_eff > n_granule:
            tn_eff = _shrink(N, tn_eff, n_granule)
        elif tm_eff > sub:
            tm_eff = _shrink(M, tm_eff, sub)
        else:
            break

    # Guarantee >= 2 parallel (i, j) output tiles so both v7x TensorCores
    # engage (no effect on single-TC v5e/v6e beyond a slightly smaller tile).
    if (Mp // tm_eff) * (Np // tn_eff) == 1:
        if tn_eff >= 256 and (tn_eff // 2) % 128 == 0:
            tn_eff //= 2
        elif tm_eff >= 2 * sub and (tm_eff // 2) % sub == 0:
            tm_eff //= 2

    grid = (Mp // tm_eff, Np // tn_eff, Kp // tk_eff)
    multi_k = grid[2] > 1
    use_acc_scratch = multi_k and not acc_in_out

    # Pad only where the layout granule forces it.  For 128-aligned K and N
    # (the common case) the weight is passed through untouched: no HBM copy.
    x2 = x.reshape(M, K)
    if (Mp, Kp) != (M, K):
        x2 = jnp.pad(x2, ((0, Mp - M), (0, Kp - K)))
    w2 = weight
    if (Kp, Np) != (K, N):
        w2 = jnp.pad(weight, ((0, Kp - K), (0, Np - N)))
    y2 = y.reshape(M, N)
    z2 = z.reshape(M, N)
    if (Mp, Np) != (M, N):
        y2 = jnp.pad(y2, ((0, Mp - M), (0, Np - N)))
        z2 = jnp.pad(z2, ((0, Mp - M), (0, Np - N)))

    in_specs = [
        pl.BlockSpec((tm_eff, tk_eff), lambda i, j, k: (i, k)),   # x tile
        pl.BlockSpec((tk_eff, tn_eff), lambda i, j, k: (k, j)),   # W tile
    ]
    args = [x2, w2]
    if has_bias:
        b2 = bias.reshape(1, N)
        if Np != N:
            b2 = jnp.pad(b2, ((0, 0), (0, Np - N)))
        in_specs.append(pl.BlockSpec((1, tn_eff), lambda i, j, k: (0, j)))
        args.append(b2)
    in_specs += [
        pl.BlockSpec((tm_eff, tn_eff), lambda i, j, k: (i, j)),   # y tile
        pl.BlockSpec((tm_eff, tn_eff), lambda i, j, k: (i, j)),   # z tile
    ]
    args += [y2, z2]

    out_spec = pl.BlockSpec((tm_eff, tn_eff), lambda i, j, k: (i, j))
    scratch_shapes = (
        [pltpu.VMEM((tm_eff, tn_eff), jnp.float32)] if use_acc_scratch else []
    )

    # VMEM limit sized from the real working set (with headroom for compiler
    # scratch), capped well below v7x's 64 MiB physical capacity.
    need = _footprint(tm_eff, tn_eff, tk_eff)
    vmem_limit = int(min(max(need * 3 // 2, 32 << 20), _VMEM_LIMIT_CAP))

    kernel = functools.partial(
        _linear_add_add_kernel,
        has_bias=has_bias, multi_k=multi_k, acc_in_out=acc_in_out,
    )

    out2 = pl.pallas_call(
        kernel,
        out_shape=jax.ShapeDtypeStruct((Mp, Np), out_dtype),
        grid_spec=pltpu.PrefetchScalarGridSpec(
            num_scalar_prefetch=0,
            grid=grid,
            in_specs=in_specs,
            out_specs=out_spec,
            scratch_shapes=scratch_shapes,
        ),
        compiler_params=pltpu.CompilerParams(
            dimension_semantics=("parallel", "parallel", "arbitrary"),
            vmem_limit_bytes=vmem_limit,
        ),
    )(*args)

    return out2[:M, :N].reshape(*lead, N)


if __name__ == "__main__":
    key = jax.random.PRNGKey(0)
    kx, ky, kz, kw, kb = jax.random.split(key, 5)
    dtype = jnp.float32

    # --- Test 1: small shapes consistent with the module (single-K-step path)
    B, S, K, N = 2, 8, 32, 32
    x = jax.random.normal(kx, (B, S, K), dtype=dtype)
    y = jax.random.normal(ky, (B, S, N), dtype=dtype)
    z = jax.random.normal(kz, (B, S, N), dtype=dtype)
    # nn.Linear(K, N) weight is (N, K); the IPEX module stores weight.T -> (K, N)
    weight_t = jax.random.normal(kw, (K, N), dtype=dtype) * 0.1
    bias = jax.random.normal(kb, (N,), dtype=dtype) * 0.1

    out = jax.block_until_ready(linear_add_add(x, weight_t, bias, y, z))
    ref = jnp.einsum("bsk,kn->bsn", x, weight_t) + bias + y + z
    assert out.shape == (B, S, N)
    assert jnp.allclose(out, ref, atol=2e-4, rtol=2e-4), "mismatch vs reference"

    # bias=None path (mm_bias_resadd with z taking the bias slot)
    out_nb = jax.block_until_ready(linear_add_add(x, weight_t, None, y, z))
    ref_nb = jnp.einsum("bsk,kn->bsn", x, weight_t) + y + z
    assert jnp.allclose(out_nb, ref_nb, atol=2e-4, rtol=2e-4)

    # --- Test 2: multi-K f32 path (accumulation directly in the output block)
    k2 = jax.random.split(jax.random.PRNGKey(1), 5)
    B2, S2, K2, N2 = 2, 128, 512, 256
    x2 = jax.random.normal(k2[0], (B2, S2, K2), dtype=dtype)
    y2 = jax.random.normal(k2[1], (B2, S2, N2), dtype=dtype)
    z2 = jax.random.normal(k2[2], (B2, S2, N2), dtype=dtype)
    w2 = jax.random.normal(k2[3], (K2, N2), dtype=dtype) * 0.05
    b2 = jax.random.normal(k2[4], (N2,), dtype=dtype) * 0.1

    out2 = jax.block_until_ready(
        linear_add_add(x2, w2, b2, y2, z2, tm=64, tn=128, tk=128)
    )
    ref2 = jnp.einsum("bsk,kn->bsn", x2, w2) + b2 + y2 + z2
    assert jnp.allclose(out2, ref2, atol=1e-3, rtol=1e-3), "tiled-path mismatch"

    # --- Test 3: bf16 inputs/outputs (multi-K path with f32 VMEM accumulator)
    xb = x2.astype(jnp.bfloat16)
    yb = y2.astype(jnp.bfloat16)
    zb = z2.astype(jnp.bfloat16)
    wb = w2.astype(jnp.bfloat16)
    bb = b2.astype(jnp.bfloat16)
    out3 = jax.block_until_ready(
        linear_add_add(xb, wb, bb, yb, zb, tm=64, tn=128, tk=128)
    )
    ref3 = (jnp.einsum("bsk,kn->bsn", xb.astype(jnp.float32),
                       wb.astype(jnp.float32))
            + bb.astype(jnp.float32) + yb.astype(jnp.float32)
            + zb.astype(jnp.float32))
    assert out3.dtype == jnp.bfloat16
    assert jnp.allclose(out3.astype(jnp.float32), ref3, atol=5e-2, rtol=5e-2), \
        "bf16-path mismatch"

    # --- Test 4: decode-like small-M shape (weight streamed once, megacore split)
    k4 = jax.random.split(jax.random.PRNGKey(2), 5)
    x4 = jax.random.normal(k4[0], (1, 4, 512), dtype=dtype)
    y4 = jax.random.normal(k4[1], (1, 4, 512), dtype=dtype)
    z4 = jax.random.normal(k4[2], (1, 4, 512), dtype=dtype)
    w4 = jax.random.normal(k4[3], (512, 512), dtype=dtype) * 0.05
    b4 = jax.random.normal(k4[4], (512,), dtype=dtype) * 0.1
    out4 = jax.block_until_ready(linear_add_add(x4, w4, b4, y4, z4))
    ref4 = jnp.einsum("bsk,kn->bsn", x4, w4) + b4 + y4 + z4
    assert jnp.allclose(out4, ref4, atol=1e-3, rtol=1e-3), "decode-path mismatch"

    print("KERNEL_OK")
</pallas_src>

<mosaic_0001>
module attributes {stable_mosaic.version = 11 : i64} {
  func.func @_linear_add_add_kernel(%arg0: i32, %arg1: i32, %arg2: i32, %arg3: memref<8x128xf32, #tpu.memory_space<vmem>>, %arg4: memref<128x128xf32, #tpu.memory_space<vmem>>, %arg5: memref<1x128xf32, #tpu.memory_space<vmem>>, %arg6: memref<8x128xf32, #tpu.memory_space<vmem>>, %arg7: memref<8x128xf32, #tpu.memory_space<vmem>>, %arg8: memref<8x128xf32, #tpu.memory_space<vmem>>) attributes {dimension_semantics = [#tpu.dimension_semantics<parallel>, #tpu.dimension_semantics<parallel>, #tpu.dimension_semantics<arbitrary>], iteration_bounds = array<i64: 2, 1, 1>, scalar_prefetch = 0 : i64, scratch_operands = 0 : i64, tpu.core_type = #tpu.core_type<tc>, window_params = [{transform_indices = @transform_0, window_bounds = array<i64: 8, 128>}, {transform_indices = @transform_1, window_bounds = array<i64: 128, 128>}, {transform_indices = @transform_2, window_bounds = array<i64: 1, 128>}, {transform_indices = @transform_3, window_bounds = array<i64: 8, 128>}, {transform_indices = @transform_4, window_bounds = array<i64: 8, 128>}, {transform_indices = @transform_5, window_bounds = array<i64: 8, 128>}]} {
    %c0 = arith.constant 0 : index
    %c0_0 = arith.constant 0 : index
    %0 = vector.load %arg3[%c0, %c0_0] : memref<8x128xf32, #tpu.memory_space<vmem>>, vector<8x128xf32>
    %c0_1 = arith.constant 0 : index
    %c0_2 = arith.constant 0 : index
    %1 = vector.load %arg4[%c0_1, %c0_2] : memref<128x128xf32, #tpu.memory_space<vmem>>, vector<128x128xf32>
    %cst = arith.constant dense<0.000000e+00> : vector<8x128xf32>
    %2 = tpu.matmul %0, %1, %cst {dimension_numbers = #tpu.dot_dimension_numbers<[1], [0], [0], [1], [0, 0, 1, 1], [], []>} : vector<8x128xf32>, vector<128x128xf32>, vector<8x128xf32> -> vector<8x128xf32>
    %c0_3 = arith.constant 0 : index
    %c0_4 = arith.constant 0 : index
    %3 = vector.load %arg6[%c0_3, %c0_4] : memref<8x128xf32, #tpu.memory_space<vmem>>, vector<8x128xf32>
    %c0_5 = arith.constant 0 : index
    %c0_6 = arith.constant 0 : index
    %4 = vector.load %arg7[%c0_5, %c0_6] : memref<8x128xf32, #tpu.memory_space<vmem>>, vector<8x128xf32>
    %5 = arith.addf %3, %4 : vector<8x128xf32>
    %c0_7 = arith.constant 0 : index
    %c0_8 = arith.constant 0 : index
    %6 = vector.load %arg5[%c0_7, %c0_8] : memref<1x128xf32, #tpu.memory_space<vmem>>, vector<1x128xf32>
    %7 = vector.broadcast %6 : vector<1x128xf32> to vector<8x128xf32>
    %8 = arith.addf %5, %7 : vector<8x128xf32>
    %9 = arith.addf %2, %8 : vector<8x128xf32>
    %c0_9 = arith.constant 0 : index
    %c0_10 = arith.constant 0 : index
    %10 = vector.load %arg8[%c0_9, %c0_10] : memref<8x128xf32, #tpu.memory_space<vmem>>, vector<8x128xf32>
    tpu.vector_store %arg8[%c0_9, %c0_10], %9 {strides = array<i32>} : memref<8x128xf32, #tpu.memory_space<vmem>>, vector<8x128xf32>,
    return
  }
  func.func @transform_0(%arg0: i32, %arg1: i32, %arg2: i32) -> (i32, i32) {
    %c0_i32 = arith.constant 0 : i32
    return %arg0, %arg2 : i32, i32
  }
  func.func @transform_1(%arg0: i32, %arg1: i32, %arg2: i32) -> (i32, i32) {
    %c0_i32 = arith.constant 0 : i32
    return %arg2, %arg1 : i32, i32
  }
  func.func @transform_2(%arg0: i32, %arg1: i32, %arg2: i32) -> (i32, i32) {
    %c0_i32 = arith.constant 0 : i32
    %c0_i32_0 = arith.constant 0 : i32
    return %c0_i32, %arg1 : i32, i32
  }
  func.func @transform_3(%arg0: i32, %arg1: i32, %arg2: i32) -> (i32, i32) {
    %c0_i32 = arith.constant 0 : i32
    return %arg0, %arg1 : i32, i32
  }
  func.func @transform_4(%arg0: i32, %arg1: i32, %arg2: i32) -> (i32, i32) {
    %c0_i32 = arith.constant 0 : i32
    return %arg0, %arg1 : i32, i32
  }
  func.func @transform_5(%arg0: i32, %arg1: i32, %arg2: i32) -> (i32, i32) {
    %c0_i32 = arith.constant 0 : i32
    return %arg0, %arg1 : i32, i32
  }
}

</mosaic_0001>

<bundles_post_ra>
// kernel: linear_add_add.1
= control target key start
LH: loop header
LB: loop body
LE: loop exit
PB: predicated region body
PF: predicated region fallthrough
CT: control target
= control target key end

     0   :  { %s772_s18 = smov 0   ;;  %s774_s19 = smov 0   ;;  %s866_s0 = inlined_call_operand.vmem [shape: f32[16,128], index: 0, kind: input, shape index: {}]   ;;  %s867_s1 = inlined_call_operand.vmem [shape: f32[128,128], index: 1, kind: input, shape index: {}]   ;;  %s868_s2 = inlined_call_operand.vmem [shape: f32[1,128], index: 2, kind: input, shape index: {}]   ;;  %s869_s3 = inlined_call_operand.vmem [shape: f32[16,128], index: 3, kind: input, shape index: {}]   ;;  %s870_s4 = inlined_call_operand.vmem [shape: f32[16,128], index: 4, kind: input, shape index: {}]   ;;  %s871_s5 = inlined_call_operand.vmem [shape: f32[16,128], index: 5, kind: output, shape index: {}]  }
   0x1   :  { %s776_s20 = smov 0  }
   0x2 LB: > { %s34_s21 = sadd.s32 1, %s733_s19  ;;  %p604_p0 = scmp.ge.s32.totalorder %s737_s20, 1  ;;  %s737_s20 = sphi %s776_s20, %s15_s20   ;;  %s733_s19 = sphi %s774_s19, %s873_s19   ;;  %s729_s18 = sphi %s772_s18, %s872_s18  }
   0x3   : > { %p36_p1 = scmp.ge.s32.totalorder %s34_s21, 2  ;;  %p264_p2 = scmp.lt.s32.totalorder %s737_s20, 3 }
   0x5   : > { %s875_s21 = smov (%p36_p1, %s34_s21), 0  ;;  %p265_p3 = pnand %p604_p0, %p264_p2 }
   0x6   : > { %v362_v0 = vld [vmem:[%s867_s1] sm:$0xff] (!%p265_p3)  ;;  %v363_v1 = vld [vmem:[%s867_s1 + $0x8] sm:$0xff] (!%p265_p3)  ;;  %v364_v2 = vld [vmem:[%s867_s1 + $0x10] sm:$0xff] (!%p265_p3)  ;;  %v739_v3 = vmov (!%p265_p3), 0.0|0.0   ;;  %vm740_vm0 = vmmov (!%p265_p3), 0   ;;  %v741_v6 = vmov (!%p265_p3), 0.0  }
   0x7   : > { %268 = sbr.rel (%p265_p3) target bundleno = 255 (0xff), region = 40  ;;  %664 = vmatprep.subr.bf16.mxu0 (!%p265_p3), %v739_v3  ;;  %v665_v4 = vpack.c.bf16 (!%p265_p3), %v363_v1, %v362_v0  ;;  %v365_v5 = vld [vmem:[%s867_s1 + $0x18] sm:$0xff] (!%p265_p3)  ;;  %661 = vmatprep.mubr.msk.f32.mxu0 (!%p265_p3), %vm740_vm0, %v741_v6  ;;  %v366_v8 = vld [vmem:[%s867_s1 + $0x20] sm:$0xff] (!%p265_p3)  ;;  %v367_v9 = vld [vmem:[%s867_s1 + $0x28] sm:$0xff] (!%p265_p3)  ;;  %p321_p4 = scmp.lt.s32.totalorder (!%p265_p3), %s729_s18, 1 }
   0x8   : > { %v668_v7 = vpack.c.bf16 (!%p265_p3), %v365_v5, %v364_v2  ;;  %v671_v10 = vpack.c.bf16 (!%p265_p3), %v367_v9, %v366_v8  ;;  %v368_v11 = vld [vmem:[%s867_s1 + $0x30] sm:$0xff] (!%p265_p3)  ;;  %v369_v12 = vld [vmem:[%s867_s1 + $0x38] sm:$0xff] (!%p265_p3)  ;;  %v370_v14 = vld [vmem:[%s867_s1 + $0x40] sm:$0xff] (!%p265_p3) }
   0x9   : > { %666 = vmatpush3.bf16.msra.mxu0 (!%p265_p3), %v665_v4  ;;  %v674_v13 = vpack.c.bf16 (!%p265_p3), %v369_v12, %v368_v11  ;;  %v371_v15 = vld [vmem:[%s867_s1 + $0x48] sm:$0xff] (!%p265_p3)  ;;  %v372_v17 = vld [vmem:[%s867_s1 + $0x50] sm:$0xff] (!%p265_p3)  ;;  %v373_v18 = vld [vmem:[%s867_s1 + $0x58] sm:$0xff] (!%p265_p3) }
   0xa   : > { %667 = vmatprep.subr.bf16.mxu0 (!%p265_p3), %v739_v3  ;;  %v677_v16 = vpack.c.bf16 (!%p265_p3), %v371_v15, %v370_v14  ;;  %v680_v19 = vpack.c.bf16 (!%p265_p3), %v373_v18, %v372_v17  ;;  %v374_v20 = vld [vmem:[%s867_s1 + $0x60] sm:$0xff] (!%p265_p3)  ;;  %v375_v21 = vld [vmem:[%s867_s1 + $0x68] sm:$0xff] (!%p265_p3)  ;;  %v376_v23 = vld [vmem:[%s867_s1 + $0x70] sm:$0xff] (!%p265_p3) }
   0xb   : > { %v683_v22 = vpack.c.bf16 (!%p265_p3), %v375_v21, %v374_v20  ;;  %v377_v24 = vld [vmem:[%s867_s1 + $0x78] sm:$0xff] (!%p265_p3)  ;;  %v609_v30 = vld [vmem:[%s868_s2] ss:$0 sm:$0xff] (!%p265_p3) }
   0xc   : > { %v686_v25 = vpack.c.bf16 (!%p265_p3), %v377_v24, %v376_v23 }
   0xd   : > { %669 = vmatpush3.bf16.msra.mxu0 (!%p265_p3), %v668_v7 }
   0xe   : > { %670 = vmatprep.subr.bf16.mxu0 %v739_v3  ;;  %s877_s18 = smov (!%p321_p4, %s729_s18), 1 }
   0xf   : > { %s605_s8 = sshll.u32 %s877_s18, 3 }
  0x10   : > { %s327_s11 = scalar_lea.vmem %s866_s0, %s605_s8  ;;  %s346_s14 = scalar_lea.vmem %s869_s3, %s605_s8 }
  0x11   : > { %672 = vmatpush3.bf16.msra.mxu0 %v671_v10  ;;  %v361_v26 = vld [vmem:[%s327_s11] sm:$0xff]  ;;  %s353_s17 = scalar_lea.vmem %s870_s4, %s605_s8  ;;  %s360_s25 = scalar_lea.vmem %s871_s5, %s605_s8 }
  0x12   : > { %673 = vmatprep.subr.bf16.mxu0 %v739_v3  ;;  %v378_v27 = vld [vmem:[%s346_s14] sm:$0xff] }
  0x13   : > { %v379_v28 = vld [vmem:[%s353_s17] sm:$0xff] }
  0x14   : > { %v380_v29 = vadd.f32 %v379_v28, %v378_v27 }
  0x15   : > { %675 = vmatpush3.bf16.msra.mxu0 %v674_v13 }
  0x16   : > { %676 = vmatprep.subr.bf16.mxu0 %v739_v3  ;;  %v388_v31 = vadd.f32 %v609_v30, %v380_v29 }
  0x19   : > { %678 = vmatpush3.bf16.msra.mxu0 %v677_v16 }
  0x1a   : > { %679 = vmatprep.subr.bf16.mxu0 %v739_v3 }
  0x1d   : > { %681 = vmatpush3.bf16.msra.mxu0 %v680_v19 }
  0x1e   : > { %682 = vmatprep.subr.bf16.mxu0 %v739_v3 }
  0x21   : > { %684 = vmatpush3.bf16.msra.mxu0 %v683_v22 }
  0x22   : > { %685 = vmatprep.subr.bf16.mxu0 %v739_v3 }
  0x25   : > { %687 = vmatpush3.bf16.msra.mxu0 %v686_v25 }
  0x28   : > { %662 = vmatmul.mubr.f32.vlgmr.msra.gmra.mrb[0].mxu0 %v361_v26 }
  0xfb   : > { %v455_v32 = vpop.f32.mrb[0].mxu0 }
  0xfc   : > { %v456_v33 = vadd.f32 %v455_v32, %v388_v31  ;;  %v663_v34 = vpop.f32.mrb[1].mxu0 }
  0xfe   : > { %459 = vst [vmem:[%s360_s25] sm:$0xff] %v456_v33 }
  0xff PF: > { %s15_s20 = sadd.s32 1, %s737_s20   ;;  %s872_s18 = smov %s733_s19 }
 0x100   : > { %p12_p5 = scmp.ge.s32.totalorder %s15_s20, 4   ;;  %s873_s19 = smov %s875_s21 }
 0x102   :  { %14 = sbr.rel (!%p12_p5) target bundleno = 2 (0x2), region = 82 }

</bundles_post_ra>
